<compile_context>
chip_gen: v6e
topology: v6e:2x2x1
jax: 0.10.0
libtpu: 0.0.40
codegen_flags: <defaults>
</compile_context>

<pallas_src>
import functools

import jax
import jax.numpy as jnp
from jax.experimental import pallas as pl
from jax.experimental.pallas import tpu as pltpu


def _conv_block_kernel(cols_ref, w_ref, o_ref, *, block_b, c2, slope, compute_dtype):
    """One grid step = `block_b` samples x one lane-dense HW tile.

    cols_ref: (block_b, K+1, hw_t)  bf16 - last row of each slab is all-ones so the
                                           bias column of W folds the bias add.
    w_ref:    (block_b*c2, K+1)     f32  - f32 so each c2-row slice lands on an
                                           (8,128) sublane tile; cast at the dot.
    o_ref:    (block_b*c2, hw_t)         - sample-major, sublane- and lane-dense.
    """
    # Unrolled per-sample loop (weights differ per sample -> one MXU call each).
    for s in range(block_b):
        w_s = w_ref[pl.ds(s * c2, c2), :].astype(compute_dtype)         # (c2, K+1)
        cols_s = cols_ref[s]                                            # (K+1, hw_t)
        acc = jnp.dot(w_s, cols_s, preferred_element_type=jnp.float32)  # MXU, f32 acc
        if slope is not None:
            # LeakyReLU / ReLU epilogue in f32 (v5e VPU has no bf16).
            acc = jnp.where(acc >= 0, acc, slope * acc)
        o_ref[pl.ds(s * c2, c2), :] = acc.astype(o_ref.dtype)


def _pick_tiles(n, c2, k1, hwp, out_itemsize, budget_bytes=40 << 20):
    """Pick (sample block B, HW tile).

    B = largest divisor of n whose output row-count (B*c2) is sublane-dense.
    hw_t = largest lane-dense divisor of hwp such that the double-buffered working
    set fits `budget_bytes` (sized for v7x's 64 MiB/TC VMEM; anything that fits v7x
    trivially fits the 128 MiB of v5e/v6e).  No forced grid>=2: single-TC chips get
    one step; v7x gets its parallelism from the HW axis at production shapes.
    """
    def block_bytes(b, hw_t):
        cols = b * k1 * hw_t * 2                 # bf16 cols, one buffer
        w = b * c2 * k1 * 4                      # f32 weights (+bias column)
        out = b * c2 * hw_t * out_itemsize
        return 2 * (cols + w + out)              # double buffered

    hw_divs = sorted(d for d in range(128, hwp + 1, 128) if hwp % d == 0) or [hwp]
    b_divs = [b for b in range(n, 0, -1) if n % b == 0 and (b * c2) % 8 == 0] or [n]
    for b in b_divs:
        for hw_t in reversed(hw_divs):
            if block_bytes(b, hw_t) <= budget_bytes:
                return b, hw_t
    return b_divs[-1], hw_divs[0]


def conv2d_block(x, conv_weight, conv_bias=None, *, stride=1, padding=1,
                 dilation=1, groups=1, padding_mode="zeros",
                 nonlinearity="leakyrelu", leaky_slope=0.2,
                 compute_dtype=jnp.bfloat16, out_dtype=None):
    """y[i] = act( conv2d(x[i], conv_weight[i]) + conv_bias[i] )  for each sample i.

    Matches _BaseConvBlock.forward with order='CNA', weight_norm_type='none',
    activation_norm_type='none', nonlinearity='leakyrelu' and a conditional
    (per-sample) 2-D conv layer with stride=1, padding=1, dilation=1, groups=1.
    """
    assert stride == 1 and dilation == 1 and groups == 1 and padding_mode == "zeros"
    # TODO(synk): stride!=1, dilation!=1, groups>1, reflect/replicate/circular padding,
    # weight-norm variants and activation norms (instance/batch/...) not implemented.

    N, C1, H, W = x.shape
    _, C2, C1w, kh, kw = conv_weight.shape
    assert C1w == C1 and kh == kw
    k = kh
    out_dtype = x.dtype if out_dtype is None else out_dtype

    if conv_bias is None:
        conv_bias = jnp.zeros((N, C2), jnp.float32)

    if nonlinearity == "leakyrelu":
        slope = float(leaky_slope)
    elif nonlinearity == "relu":
        slope = 0.0
    elif nonlinearity in ("none", "", None):
        slope = None
    else:
        raise NotImplementedError(nonlinearity)

    # ---- layout glue (wrapper / XLA side) -----------------------------------
    # Cast to bf16 BEFORE pad + im2col so the k*k patch blow-up is materialized and
    # streamed at half the bytes (it is the dominant HBM traffic of this op).
    # Axis order (C1, kh, kw, Ho, Wo) matches conv_weight.reshape(N, C2, C1*k*k).
    # TODO(synk): for production H*W, extract patches inside the kernel from a padded
    # (B, C1, Hp, Wp) VMEM block (k*k shifted accumulating dots) so x is read from HBM
    # once instead of k^2 times; at these tiny spatial sizes the shifted slices would
    # be lane-sparse relayouts, so the im2col stays in the wrapper.
    xc = x.astype(compute_dtype)
    xp = jnp.pad(xc, ((0, 0), (0, 0), (padding, padding), (padding, padding)))
    Ho = H + 2 * padding - k + 1
    Wo = W + 2 * padding - k + 1
    pats = jnp.stack(
        [jnp.stack([xp[:, :, i:i + Ho, j:j + Wo] for j in range(k)], axis=2)
         for i in range(k)],
        axis=2)                                        # (N, C1, k, k, Ho, Wo) bf16
    K = C1 * k * k
    HW = Ho * Wo
    cols = pats.reshape(N, K, HW)                      # (N, K, HW) bf16

    # Lane-dense output: pad HW to a multiple of 128 (unmasked vst), slice off later.
    HWp = ((HW + 127) // 128) * 128
    if HWp != HW:
        cols = jnp.pad(cols, ((0, 0), (0, 0), (0, HWp - HW)))

    # Fold the bias into the matmul: ones row appended to cols, bias column to W.
    cols_aug = jnp.concatenate([cols, jnp.ones((N, 1, HWp), compute_dtype)], axis=1)
    K1 = K + 1
    # Weight slab stays f32 (tiny): the per-sample C2-row slice then sits on an
    # (8,128) f32 sublane tile (a bf16 slab packs 16 rows/tile and an 8-row slice
    # would straddle it -> per-sample repack).  Cast to bf16 in-vreg at the dot.
    w2d = jnp.concatenate(
        [conv_weight.reshape(N, C2, K), conv_bias.reshape(N, C2, 1)],
        axis=2).reshape(N * C2, K1).astype(jnp.float32)

    out_itemsize = jnp.dtype(out_dtype).itemsize
    B, hw_t = _pick_tiles(N, C2, K1, HWp, out_itemsize)
    n_b, n_hw = N // B, HWp // hw_t
    grid = (n_b, n_hw)

    # cols is the only large stream; buffer it deeper once the HW axis iterates
    # (weights stay resident across j via their index_map).
    cols_spec_kwargs = {}
    if n_hw >= 3:
        cols_spec_kwargs["pipeline_mode"] = pl.Buffered(3)
    cols_spec = pl.BlockSpec((B, K1, hw_t), lambda i, j: (i, 0, j), **cols_spec_kwargs)

    # VMEM budget derived from actual block bytes (incl. buffering), with headroom;
    # tiles were chosen to keep this well under the v7x 64 MiB/TC ceiling.
    cols_blk = B * K1 * hw_t * 2
    w_blk = B * C2 * K1 * 4
    out_blk = B * C2 * hw_t * out_itemsize
    buffered = (3 if n_hw >= 3 else 2) * cols_blk + 2 * (w_blk + out_blk)
    vmem_limit = int(min(max(2 * buffered, 32 << 20), 64 << 20))

    cost = pl.CostEstimate(
        flops=2 * N * C2 * K1 * HWp,
        transcendentals=0,
        bytes_accessed=(N * K1 * HWp * 2            # cols (bf16)
                        + N * C2 * K1 * 4           # weights (f32)
                        + N * C2 * HWp * out_itemsize))

    out2d = pl.pallas_call(
        functools.partial(_conv_block_kernel, block_b=B, c2=C2, slope=slope,
                          compute_dtype=compute_dtype),
        out_shape=jax.ShapeDtypeStruct((N * C2, HWp), out_dtype),
        grid_spec=pltpu.PrefetchScalarGridSpec(
            num_scalar_prefetch=0,
            grid=grid,
            in_specs=[
                cols_spec,                                           # (B, K+1, hw_t)
                pl.BlockSpec((B * C2, K1), lambda i, j: (i, 0)),     # weights, dense
            ],
            out_specs=pl.BlockSpec((B * C2, hw_t), lambda i, j: (i, j)),
        ),
        compiler_params=pltpu.CompilerParams(
            # Both axes are independent (no cross-step accumulator).  On v7x the HW
            # axis provides the 2-TC parallelism at production shapes; on single-TC
            # v5e/v6e the grid is just a loop and stays as short as possible.
            dimension_semantics=("parallel", "parallel"),
            vmem_limit_bytes=vmem_limit,
        ),
        cost_estimate=cost,
    )(cols_aug, w2d)

    out = out2d.reshape(N, C2, HWp)
    if HWp != HW:
        out = out[:, :, :HW]
    return out.reshape(N, C2, Ho, Wo)


def _ref_conv_block(x, conv_weight, conv_bias, *, slope=0.2, padding=1):
    """Pure-JAX reference: per-sample conv2d + bias + LeakyReLU."""
    def per_sample(xi, wi, bi):
        yi = jax.lax.conv_general_dilated(
            xi[None], wi, window_strides=(1, 1),
            padding=((padding, padding), (padding, padding)),
            dimension_numbers=("NCHW", "OIHW", "NCHW"),
            precision=jax.lax.Precision.HIGHEST)[0]
        yi = yi + bi[:, None, None]
        if slope is not None:
            yi = jnp.where(yi >= 0, yi, slope * yi)
        return yi
    return jax.vmap(per_sample)(x, conv_weight, conv_bias)


if __name__ == "__main__":
    key = jax.random.PRNGKey(0)
    kx, kw_, kb = jax.random.split(key, 3)

    # Small shapes consistent with the block: 8 samples, C1=4 -> C2=8, 16x16, k=3.
    N, C1, C2, H, W, k = 8, 4, 8, 16, 16, 3
    x = jax.random.normal(kx, (N, C1, H, W), jnp.float32)
    conv_weight = 0.1 * jax.random.normal(kw_, (N, C2, C1, k, k), jnp.float32)
    conv_bias = jax.random.normal(kb, (N, C2), jnp.float32)

    y = conv2d_block(x, conv_weight, conv_bias)
    y = jax.block_until_ready(y)

    # Reference evaluated on the same bf16-rounded operands the kernel consumes
    # (x and the weights/bias are bf16 at the MXU; accumulation is f32 in both paths).
    xb = x.astype(jnp.bfloat16).astype(jnp.float32)
    wb = conv_weight.astype(jnp.bfloat16).astype(jnp.float32)
    bb = conv_bias.astype(jnp.bfloat16).astype(jnp.float32)
    y_ref = _ref_conv_block(xb, wb, bb, slope=0.2)

    assert y.shape == (N, C2, H, W), y.shape
    err = float(jnp.max(jnp.abs(y - y_ref)))
    assert jnp.allclose(y, y_ref, atol=1e-2, rtol=1e-2), f"mismatch vs reference, max abs err={err}"

    print("KERNEL_OK")
</pallas_src>

<mosaic_0001>
module attributes {stable_mosaic.version = 11 : i64} {
  func.func @_conv_block_kernel(%arg0: i32, %arg1: i32, %arg2: memref<8x37x256xbf16, #tpu.memory_space<vmem>>, %arg3: memref<64x37xf32, #tpu.memory_space<vmem>>, %arg4: memref<64x256xf32, #tpu.memory_space<vmem>>) attributes {dimension_semantics = [#tpu.dimension_semantics<parallel>, #tpu.dimension_semantics<parallel>], iteration_bounds = array<i64: 1, 1>, scalar_prefetch = 0 : i64, scratch_operands = 0 : i64, tpu.core_type = #tpu.core_type<tc>, window_params = [{transform_indices = @transform_0, window_bounds = array<i64: 8, 37, 256>}, {transform_indices = @transform_1, window_bounds = array<i64: 64, 37>}, {transform_indices = @transform_2, window_bounds = array<i64: 64, 256>}]} {
    %c0 = arith.constant 0 : index
    %c0_0 = arith.constant 0 : index
    %0 = vector.load %arg3[%c0, %c0_0] : memref<64x37xf32, #tpu.memory_space<vmem>>, vector<8x37xf32>
    %1 = arith.truncf %0 : vector<8x37xf32> to vector<8x37xbf16>
    %c0_1 = arith.constant 0 : index
    %c0_2 = arith.constant 0 : index
    %c0_3 = arith.constant 0 : index
    %2 = vector.load %arg2[%c0_1, %c0_2, %c0_3] : memref<8x37x256xbf16, #tpu.memory_space<vmem>>, vector<1x37x256xbf16>
    %3 = vector.shape_cast %2 : vector<1x37x256xbf16> to vector<37x256xbf16>
    %cst = arith.constant dense<0.000000e+00> : vector<8x256xf32>
    %4 = tpu.matmul %1, %3, %cst {dimension_numbers = #tpu.dot_dimension_numbers<[1], [0], [0], [1], [0, 0, 1, 1], [], []>} : vector<8x37xbf16>, vector<37x256xbf16>, vector<8x256xf32> -> vector<8x256xf32>
    %cst_4 = arith.constant 0.000000e+00 : f32
    %5 = vector.broadcast %cst_4 : f32 to vector<8x256xf32>
    %6 = arith.cmpf oge, %4, %5 : vector<8x256xf32>
    %cst_5 = arith.constant 2.000000e-01 : f32
    %7 = vector.broadcast %cst_5 : f32 to vector<8x256xf32>
    %8 = arith.mulf %7, %4 : vector<8x256xf32>
    %9 = arith.select %6, %4, %8 : vector<8x256xi1>, vector<8x256xf32>
    %c0_6 = arith.constant 0 : index
    %c0_7 = arith.constant 0 : index
    %10 = vector.load %arg4[%c0_6, %c0_7] : memref<64x256xf32, #tpu.memory_space<vmem>>, vector<8x256xf32>
    tpu.vector_store %arg4[%c0_6, %c0_7], %9 {strides = array<i32>} : memref<64x256xf32, #tpu.memory_space<vmem>>, vector<8x256xf32>,
    %c8 = arith.constant 8 : index
    %c0_8 = arith.constant 0 : index
    %11 = vector.load %arg3[%c8, %c0_8] : memref<64x37xf32, #tpu.memory_space<vmem>>, vector<8x37xf32>
    %12 = arith.truncf %11 : vector<8x37xf32> to vector<8x37xbf16>
    %c1 = arith.constant 1 : index
    %c0_9 = arith.constant 0 : index
    %c0_10 = arith.constant 0 : index
    %13 = vector.load %arg2[%c1, %c0_9, %c0_10] : memref<8x37x256xbf16, #tpu.memory_space<vmem>>, vector<1x37x256xbf16>
    %14 = vector.shape_cast %13 : vector<1x37x256xbf16> to vector<37x256xbf16>
    %cst_11 = arith.constant dense<0.000000e+00> : vector<8x256xf32>
    %15 = tpu.matmul %12, %14, %cst_11 {dimension_numbers = #tpu.dot_dimension_numbers<[1], [0], [0], [1], [0, 0, 1, 1], [], []>} : vector<8x37xbf16>, vector<37x256xbf16>, vector<8x256xf32> -> vector<8x256xf32>
    %cst_12 = arith.constant 0.000000e+00 : f32
    %16 = vector.broadcast %cst_12 : f32 to vector<8x256xf32>
    %17 = arith.cmpf oge, %15, %16 : vector<8x256xf32>
    %cst_13 = arith.constant 2.000000e-01 : f32
    %18 = vector.broadcast %cst_13 : f32 to vector<8x256xf32>
    %19 = arith.mulf %18, %15 : vector<8x256xf32>
    %20 = arith.select %17, %15, %19 : vector<8x256xi1>, vector<8x256xf32>
    %c8_14 = arith.constant 8 : index
    %c0_15 = arith.constant 0 : index
    %21 = vector.load %arg4[%c8_14, %c0_15] : memref<64x256xf32, #tpu.memory_space<vmem>>, vector<8x256xf32>
    tpu.vector_store %arg4[%c8_14, %c0_15], %20 {strides = array<i32>} : memref<64x256xf32, #tpu.memory_space<vmem>>, vector<8x256xf32>,
    %c16 = arith.constant 16 : index
    %c0_16 = arith.constant 0 : index
    %22 = vector.load %arg3[%c16, %c0_16] : memref<64x37xf32, #tpu.memory_space<vmem>>, vector<8x37xf32>
    %23 = arith.truncf %22 : vector<8x37xf32> to vector<8x37xbf16>
    %c2 = arith.constant 2 : index
    %c0_17 = arith.constant 0 : index
    %c0_18 = arith.constant 0 : index
    %24 = vector.load %arg2[%c2, %c0_17, %c0_18] : memref<8x37x256xbf16, #tpu.memory_space<vmem>>, vector<1x37x256xbf16>
    %25 = vector.shape_cast %24 : vector<1x37x256xbf16> to vector<37x256xbf16>
    %cst_19 = arith.constant dense<0.000000e+00> : vector<8x256xf32>
    %26 = tpu.matmul %23, %25, %cst_19 {dimension_numbers = #tpu.dot_dimension_numbers<[1], [0], [0], [1], [0, 0, 1, 1], [], []>} : vector<8x37xbf16>, vector<37x256xbf16>, vector<8x256xf32> -> vector<8x256xf32>
    %cst_20 = arith.constant 0.000000e+00 : f32
    %27 = vector.broadcast %cst_20 : f32 to vector<8x256xf32>
    %28 = arith.cmpf oge, %26, %27 : vector<8x256xf32>
    %cst_21 = arith.constant 2.000000e-01 : f32
    %29 = vector.broadcast %cst_21 : f32 to vector<8x256xf32>
    %30 = arith.mulf %29, %26 : vector<8x256xf32>
    %31 = arith.select %28, %26, %30 : vector<8x256xi1>, vector<8x256xf32>
    %c16_22 = arith.constant 16 : index
    %c0_23 = arith.constant 0 : index
    %32 = vector.load %arg4[%c16_22, %c0_23] : memref<64x256xf32, #tpu.memory_space<vmem>>, vector<8x256xf32>
    tpu.vector_store %arg4[%c16_22, %c0_23], %31 {strides = array<i32>} : memref<64x256xf32, #tpu.memory_space<vmem>>, vector<8x256xf32>,
    %c24 = arith.constant 24 : index
    %c0_24 = arith.constant 0 : index
    %33 = vector.load %arg3[%c24, %c0_24] : memref<64x37xf32, #tpu.memory_space<vmem>>, vector<8x37xf32>
    %34 = arith.truncf %33 : vector<8x37xf32> to vector<8x37xbf16>
    %c3 = arith.constant 3 : index
    %c0_25 = arith.constant 0 : index
    %c0_26 = arith.constant 0 : index
    %35 = vector.load %arg2[%c3, %c0_25, %c0_26] : memref<8x37x256xbf16, #tpu.memory_space<vmem>>, vector<1x37x256xbf16>
    %36 = vector.shape_cast %35 : vector<1x37x256xbf16> to vector<37x256xbf16>
    %cst_27 = arith.constant dense<0.000000e+00> : vector<8x256xf32>
    %37 = tpu.matmul %34, %36, %cst_27 {dimension_numbers = #tpu.dot_dimension_numbers<[1], [0], [0], [1], [0, 0, 1, 1], [], []>} : vector<8x37xbf16>, vector<37x256xbf16>, vector<8x256xf32> -> vector<8x256xf32>
    %cst_28 = arith.constant 0.000000e+00 : f32
    %38 = vector.broadcast %cst_28 : f32 to vector<8x256xf32>
    %39 = arith.cmpf oge, %37, %38 : vector<8x256xf32>
    %cst_29 = arith.constant 2.000000e-01 : f32
    %40 = vector.broadcast %cst_29 : f32 to vector<8x256xf32>
    %41 = arith.mulf %40, %37 : vector<8x256xf32>
    %42 = arith.select %39, %37, %41 : vector<8x256xi1>, vector<8x256xf32>
    %c24_30 = arith.constant 24 : index
    %c0_31 = arith.constant 0 : index
    %43 = vector.load %arg4[%c24_30, %c0_31] : memref<64x256xf32, #tpu.memory_space<vmem>>, vector<8x256xf32>
    tpu.vector_store %arg4[%c24_30, %c0_31], %42 {strides = array<i32>} : memref<64x256xf32, #tpu.memory_space<vmem>>, vector<8x256xf32>,
    %c32 = arith.constant 32 : index
    %c0_32 = arith.constant 0 : index
    %44 = vector.load %arg3[%c32, %c0_32] : memref<64x37xf32, #tpu.memory_space<vmem>>, vector<8x37xf32>
    %45 = arith.truncf %44 : vector<8x37xf32> to vector<8x37xbf16>
    %c4 = arith.constant 4 : index
    %c0_33 = arith.constant 0 : index
    %c0_34 = arith.constant 0 : index
    %46 = vector.load %arg2[%c4, %c0_33, %c0_34] : memref<8x37x256xbf16, #tpu.memory_space<vmem>>, vector<1x37x256xbf16>
    %47 = vector.shape_cast %46 : vector<1x37x256xbf16> to vector<37x256xbf16>
    %cst_35 = arith.constant dense<0.000000e+00> : vector<8x256xf32>
    %48 = tpu.matmul %45, %47, %cst_35 {dimension_numbers = #tpu.dot_dimension_numbers<[1], [0], [0], [1], [0, 0, 1, 1], [], []>} : vector<8x37xbf16>, vector<37x256xbf16>, vector<8x256xf32> -> vector<8x256xf32>
    %cst_36 = arith.constant 0.000000e+00 : f32
    %49 = vector.broadcast %cst_36 : f32 to vector<8x256xf32>
    %50 = arith.cmpf oge, %48, %49 : vector<8x256xf32>
    %cst_37 = arith.constant 2.000000e-01 : f32
    %51 = vector.broadcast %cst_37 : f32 to vector<8x256xf32>
    %52 = arith.mulf %51, %48 : vector<8x256xf32>
    %53 = arith.select %50, %48, %52 : vector<8x256xi1>, vector<8x256xf32>
    %c32_38 = arith.constant 32 : index
    %c0_39 = arith.constant 0 : index
    %54 = vector.load %arg4[%c32_38, %c0_39] : memref<64x256xf32, #tpu.memory_space<vmem>>, vector<8x256xf32>
    tpu.vector_store %arg4[%c32_38, %c0_39], %53 {strides = array<i32>} : memref<64x256xf32, #tpu.memory_space<vmem>>, vector<8x256xf32>,
    %c40 = arith.constant 40 : index
    %c0_40 = arith.constant 0 : index
    %55 = vector.load %arg3[%c40, %c0_40] : memref<64x37xf32, #tpu.memory_space<vmem>>, vector<8x37xf32>
    %56 = arith.truncf %55 : vector<8x37xf32> to vector<8x37xbf16>
    %c5 = arith.constant 5 : index
    %c0_41 = arith.constant 0 : index
    %c0_42 = arith.constant 0 : index
    %57 = vector.load %arg2[%c5, %c0_41, %c0_42] : memref<8x37x256xbf16, #tpu.memory_space<vmem>>, vector<1x37x256xbf16>
    %58 = vector.shape_cast %57 : vector<1x37x256xbf16> to vector<37x256xbf16>
    %cst_43 = arith.constant dense<0.000000e+00> : vector<8x256xf32>
    %59 = tpu.matmul %56, %58, %cst_43 {dimension_numbers = #tpu.dot_dimension_numbers<[1], [0], [0], [1], [0, 0, 1, 1], [], []>} : vector<8x37xbf16>, vector<37x256xbf16>, vector<8x256xf32> -> vector<8x256xf32>
    %cst_44 = arith.constant 0.000000e+00 : f32
    %60 = vector.broadcast %cst_44 : f32 to vector<8x256xf32>
    %61 = arith.cmpf oge, %59, %60 : vector<8x256xf32>
    %cst_45 = arith.constant 2.000000e-01 : f32
    %62 = vector.broadcast %cst_45 : f32 to vector<8x256xf32>
    %63 = arith.mulf %62, %59 : vector<8x256xf32>
    %64 = arith.select %61, %59, %63 : vector<8x256xi1>, vector<8x256xf32>
    %c40_46 = arith.constant 40 : index
    %c0_47 = arith.constant 0 : index
    %65 = vector.load %arg4[%c40_46, %c0_47] : memref<64x256xf32, #tpu.memory_space<vmem>>, vector<8x256xf32>
    tpu.vector_store %arg4[%c40_46, %c0_47], %64 {strides = array<i32>} : memref<64x256xf32, #tpu.memory_space<vmem>>, vector<8x256xf32>,
    %c48 = arith.constant 48 : index
    %c0_48 = arith.constant 0 : index
    %66 = vector.load %arg3[%c48, %c0_48] : memref<64x37xf32, #tpu.memory_space<vmem>>, vector<8x37xf32>
    %67 = arith.truncf %66 : vector<8x37xf32> to vector<8x37xbf16>
    %c6 = arith.constant 6 : index
    %c0_49 = arith.constant 0 : index
    %c0_50 = arith.constant 0 : index
    %68 = vector.load %arg2[%c6, %c0_49, %c0_50] : memref<8x37x256xbf16, #tpu.memory_space<vmem>>, vector<1x37x256xbf16>
    %69 = vector.shape_cast %68 : vector<1x37x256xbf16> to vector<37x256xbf16>
    %cst_51 = arith.constant dense<0.000000e+00> : vector<8x256xf32>
    %70 = tpu.matmul %67, %69, %cst_51 {dimension_numbers = #tpu.dot_dimension_numbers<[1], [0], [0], [1], [0, 0, 1, 1], [], []>} : vector<8x37xbf16>, vector<37x256xbf16>, vector<8x256xf32> -> vector<8x256xf32>
    %cst_52 = arith.constant 0.000000e+00 : f32
    %71 = vector.broadcast %cst_52 : f32 to vector<8x256xf32>
    %72 = arith.cmpf oge, %70, %71 : vector<8x256xf32>
    %cst_53 = arith.constant 2.000000e-01 : f32
    %73 = vector.broadcast %cst_53 : f32 to vector<8x256xf32>
    %74 = arith.mulf %73, %70 : vector<8x256xf32>
    %75 = arith.select %72, %70, %74 : vector<8x256xi1>, vector<8x256xf32>
    %c48_54 = arith.constant 48 : index
    %c0_55 = arith.constant 0 : index
    %76 = vector.load %arg4[%c48_54, %c0_55] : memref<64x256xf32, #tpu.memory_space<vmem>>, vector<8x256xf32>
    tpu.vector_store %arg4[%c48_54, %c0_55], %75 {strides = array<i32>} : memref<64x256xf32, #tpu.memory_space<vmem>>, vector<8x256xf32>,
    %c56 = arith.constant 56 : index
    %c0_56 = arith.constant 0 : index
    %77 = vector.load %arg3[%c56, %c0_56] : memref<64x37xf32, #tpu.memory_space<vmem>>, vector<8x37xf32>
    %78 = arith.truncf %77 : vector<8x37xf32> to vector<8x37xbf16>
    %c7 = arith.constant 7 : index
    %c0_57 = arith.constant 0 : index
    %c0_58 = arith.constant 0 : index
    %79 = vector.load %arg2[%c7, %c0_57, %c0_58] : memref<8x37x256xbf16, #tpu.memory_space<vmem>>, vector<1x37x256xbf16>
    %80 = vector.shape_cast %79 : vector<1x37x256xbf16> to vector<37x256xbf16>
    %cst_59 = arith.constant dense<0.000000e+00> : vector<8x256xf32>
    %81 = tpu.matmul %78, %80, %cst_59 {dimension_numbers = #tpu.dot_dimension_numbers<[1], [0], [0], [1], [0, 0, 1, 1], [], []>} : vector<8x37xbf16>, vector<37x256xbf16>, vector<8x256xf32> -> vector<8x256xf32>
    %cst_60 = arith.constant 0.000000e+00 : f32
    %82 = vector.broadcast %cst_60 : f32 to vector<8x256xf32>
    %83 = arith.cmpf oge, %81, %82 : vector<8x256xf32>
    %cst_61 = arith.constant 2.000000e-01 : f32
    %84 = vector.broadcast %cst_61 : f32 to vector<8x256xf32>
    %85 = arith.mulf %84, %81 : vector<8x256xf32>
    %86 = arith.select %83, %81, %85 : vector<8x256xi1>, vector<8x256xf32>
    %c56_62 = arith.constant 56 : index
    %c0_63 = arith.constant 0 : index
    %87 = vector.load %arg4[%c56_62, %c0_63] : memref<64x256xf32, #tpu.memory_space<vmem>>, vector<8x256xf32>
    tpu.vector_store %arg4[%c56_62, %c0_63], %86 {strides = array<i32>} : memref<64x256xf32, #tpu.memory_space<vmem>>, vector<8x256xf32>,
    return
  }
  func.func @transform_0(%arg0: i32, %arg1: i32) -> (i32, i32, i32) {
    %c0_i32 = arith.constant 0 : i32
    %c0_i32_0 = arith.constant 0 : i32
    return %arg0, %c0_i32, %arg1 : i32, i32, i32
  }
  func.func @transform_1(%arg0: i32, %arg1: i32) -> (i32, i32) {
    %c0_i32 = arith.constant 0 : i32
    %c0_i32_0 = arith.constant 0 : i32
    return %arg0, %c0_i32 : i32, i32
  }
  func.func @transform_2(%arg0: i32, %arg1: i32) -> (i32, i32) {
    %c0_i32 = arith.constant 0 : i32
    return %arg0, %arg1 : i32, i32
  }
}

</mosaic_0001>

<bundles_post_ra>
// kernel: tpu_custom_call.1
= control target key start
LH: loop header
LB: loop body
LE: loop exit
PB: predicated region body
PF: predicated region fallthrough
CT: control target
= control target key end

     0   :  { %vm49_vm0 = vcmask 1041408   ;;  %vm50_vm1 = vcmask 1042432   ;;  %v943_v2 = vmov 65535   ;;  %v944_v12 = vmov 0   ;;  %s1144_s0 = inlined_call_operand.vmem [shape: bf16[8,37,256], index: 0, kind: input, shape index: {}]   ;;  %s1145_s1 = inlined_call_operand.vmem [shape: f32[64,37], index: 1, kind: input, shape index: {}]   ;;  %s1146_s2 = inlined_call_operand.hbm [shape: f32[64,256], index: 2, kind: output, shape index: {}]  }
   0x1   :  { %v19_v0 = vld [vmem:[%s1144_s0 + $0x20] sm:$0x77]  ;;  %v51_v3 = vsel %vm49_vm0, 4294967295, %v943_v2  ;;  %v772_v4 = vld [vmem:[%s1144_s0 + $0x48] sm:$0x77]  ;;  %91 = vmatprep.mubr.bf16.mxu0 %v944_v12  ;;  %182 = vmatprep.mubr.bf16.mxu1 %v944_v12  ;;  %vm45_vm2 = vcmask 302080  }
   0x2   :  { %v766_v1 = vcombine.high %v19_v0, %v19_v0  ;;  %v765_v5 = vcombine.low %v19_v0, %v19_v0  ;;  %v969_v6 = vsel %vm50_vm1, %v51_v3, 0  ;;  %v778_v7 = vcombine.high %v772_v4, %v772_v4  ;;  %v861_v11 = vld [vmem:[%s1144_s0 + $0x14] ss:$8 sps:$4 sm:$0xff]   ;;  %v865_v16 = vld [vmem:[%s1144_s0 + $0x10] ss:$8 sps:$4 sm:$0xff]   ;;  %v13_v25 = vld [vmem:[%s1145_s1] sm:$0xff] }
   0x3   :  { %v777_v8 = vcombine.low %v772_v4, %v772_v4  ;;  %v863_v15 = vld [vmem:[%s1144_s0 + $0x3c] ss:$8 sps:$4 sm:$0xff]   ;;  %v866_v17 = vld [vmem:[%s1144_s0 + $0x38] ss:$8 sps:$4 sm:$0xff]   ;;  %v784_v19 = vld [vmem:[%s1144_s0 + $0x70] sm:$0x77]  ;;  %v14_v32 = vpack.c.bf16 %v13_v25, %v13_v25 }
   0x4   :  { %v57_v9 = vand.u32 %v766_v1, %v969_v6  ;;  %v54_v10 = vand.u32 %v765_v5, %v969_v6  ;;  %v148_v13 = vand.u32 %v778_v7, %v969_v6  ;;  %v867_v18 = vld [vmem:[%s1144_s0 + $0x4] ss:$8 sps:$4 sm:$0xff]   ;;  %v796_v20 = vld [vmem:[%s1144_s0 + $0x98] sm:$0x77]  ;;  %v790_v22 = vcombine.high %v784_v19, %v784_v19  ;;  %v871_v24 = vld [vmem:[%s1144_s0] ss:$8 sps:$4 sm:$0xff]  }
   0x5   :  { %v145_v14 = vand.u32 %v777_v8, %v969_v6  ;;  %v869_v21 = vld [vmem:[%s1144_s0 + $0x2c] ss:$8 sps:$4 sm:$0xff]   ;;  %v802_v23 = vcombine.high %v796_v20, %v796_v20  ;;  %v789_v26 = vcombine.low %v784_v19, %v784_v19  ;;  %v872_v27 = vld [vmem:[%s1144_s0 + $0x28] ss:$8 sps:$4 sm:$0xff]   ;;  %v801_v30 = vcombine.low %v796_v20, %v796_v20  ;;  %v808_v38 = vld [vmem:[%s1144_s0 + $0xc0] sm:$0x77] }
   0x6   :  { %69 = vmatprep.subr.bf16.mxu0 %v57_v9  ;;  %160 = vmatprep.subr.bf16.mxu1 %v148_v13  ;;  %v108_v28 = vld [vmem:[%s1145_s1 + $0x8] sm:$0xff]  ;;  %v239_v29 = vand.u32 %v790_v22, %v969_v6  ;;  %v885_v42 = vld [vmem:[%s1144_s0 + $0x54] ss:$8 sps:$4 sm:$0xff]   ;;  %v814_v43 = vcombine.high %v808_v38, %v808_v38  ;;  %v883_v46 = vld [vmem:[%s1144_s0 + $0x50] ss:$8 sps:$4 sm:$0xff]   ;;  %v813_v48 = vcombine.low %v808_v38, %v808_v38 }
   0x7   :  { %70 = vmatpush1.bf16.msra.mxu0 %v54_v10  ;;  %161 = vmatpush1.bf16.msra.mxu1 %v145_v14  ;;  %v330_v31 = vand.u32 %v802_v23, %v969_v6  ;;  %v109_v33 = vpack.c.bf16 %v108_v28, %v108_v28  ;;  %v236_v34 = vand.u32 %v789_v26, %v969_v6  ;;  %v879_v36 = vld [vmem:[%s1144_s0 + $0x64] ss:$8 sps:$4 sm:$0xff]   ;;  %v877_v40 = vld [vmem:[%s1144_s0 + $0x60] ss:$8 sps:$4 sm:$0xff]   ;;  %v199_v47 = vld [vmem:[%s1145_s1 + $0x10] sm:$0xff] }
   0x8   :  { %71 = vmatprep.subr.bf16.mxu0 %v861_v11  ;;  %162 = vmatprep.subr.bf16.mxu1 %v863_v15  ;;  %v327_v35 = vand.u32 %v801_v30, %v969_v6  ;;  %v882_v37 = vld [vmem:[%s1144_s0 + $0x8c] ss:$8 sps:$4 sm:$0xff]   ;;  %v880_v41 = vld [vmem:[%s1144_s0 + $0x88] ss:$8 sps:$4 sm:$0xff]   ;;  %v888_v44 = vld [vmem:[%s1144_s0 + $0x7c] ss:$8 sps:$4 sm:$0xff]   ;;  %v421_v51 = vand.u32 %v814_v43, %v969_v6  ;;  %v200_v54 = vpack.c.bf16 %v199_v47, %v199_v47 }
   0x9   :  { %v820_v39 = vld [vmem:[%s1144_s0 + $0xe8] sm:$0x77]  ;;  %v886_v49 = vld [vmem:[%s1144_s0 + $0x78] ss:$8 sps:$4 sm:$0xff]   ;;  %v418_v56 = vand.u32 %v813_v48, %v969_v6  ;;  %v895_v58 = vld [vmem:[%s1144_s0 + $0xb4] ss:$8 sps:$4 sm:$0xff]  }
   0xa   :  { %v826_v45 = vcombine.high %v820_v39, %v820_v39  ;;  %v290_v50 = vld [vmem:[%s1145_s1 + $0x18] sm:$0xff]  ;;  %v825_v52 = vcombine.low %v820_v39, %v820_v39 }
   0xb   :  { %72 = vmatpush1.bf16.msra.mxu0 %v865_v16  ;;  %163 = vmatpush1.bf16.msra.mxu1 %v866_v17  ;;  %v291_v55 = vpack.c.bf16 %v290_v50, %v290_v50 }
   0xc   :  { %73 = vmatprep.subr.bf16.mxu0 %v867_v18  ;;  %164 = vmatprep.subr.bf16.mxu1 %v869_v21  ;;  %v512_v53 = vand.u32 %v826_v45, %v969_v6  ;;  %v509_v57 = vand.u32 %v825_v52, %v969_v6 }
   0xf   :  { %74 = vmatpush1.bf16.msra.mxu0 %v871_v24  ;;  %165 = vmatpush1.bf16.msra.mxu1 %v872_v27 }
  0x10   :  { %251 = vmatprep.subr.bf16.mxu0 %v239_v29  ;;  %342 = vmatprep.subr.bf16.mxu1 %v330_v31 }
  0x12   :  { %767 = vmatmul.mubr.msk.bf16.vlgmr.msra.gmra.mxu0 %vm45_vm2, %v14_v32  ;;  %779 = vmatmul.mubr.msk.bf16.vlgmr.msra.gmra.mxu1 %vm45_vm2, %v109_v33 }
  0x13   :  { %252 = vmatpush1.bf16.msra.mxu0 %v236_v34  ;;  %343 = vmatpush1.bf16.msra.mxu1 %v327_v35 }
  0x14   :  { %253 = vmatprep.subr.bf16.mxu0 %v879_v36  ;;  %344 = vmatprep.subr.bf16.mxu1 %v882_v37 }
  0x15   :  { %273 = vmatprep.mubr.bf16.mxu0 %v944_v12  ;;  %364 = vmatprep.mubr.bf16.mxu1 %v944_v12 }
  0x17   :  { %254 = vmatpush1.bf16.msra.mxu0 %v877_v40  ;;  %345 = vmatpush1.bf16.msra.mxu1 %v880_v41 }
  0x18   :  { %255 = vmatprep.subr.bf16.mxu0 %v885_v42  ;;  %346 = vmatprep.subr.bf16.mxu1 %v888_v44 }
  0x1b   :  { %256 = vmatpush1.bf16.msra.mxu0 %v883_v46  ;;  %347 = vmatpush1.bf16.msra.mxu1 %v886_v49 }
  0x1c   :  { %433 = vmatprep.subr.bf16.mxu0 %v421_v51 }
  0x1d   :  { %7 = vsyncpa [#allocation3], 0  ;;  %524 = vmatprep.subr.bf16.mxu1 %v512_v53  ;;  %v898_v59 = vld [vmem:[%s1144_s0 + $0xdc] ss:$8 sps:$4 sm:$0xff]   ;;  %v832_v60 = vld [vmem:[%s1144_s0 + $0x110] sm:$0x77] }
  0x1e   :  { %791 = vmatmul.mubr.msk.bf16.vlgmr.msra.gmra.mxu0 %vm45_vm2, %v200_v54  ;;  %v844_v61 = vld [vmem:[%s1144_s0 + $0x138] sm:$0x77]  ;;  %803 = vmatmul.mubr.msk.bf16.vlgmr.msra.gmra.mxu1 %vm45_vm2, %v291_v55  ;;  %v901_v0 = vld [vmem:[%s1144_s0 + $0xa4] ss:$8 sps:$4 sm:$0xff]   ;;  %v838_v1 = vcombine.high %v832_v60, %v832_v60  ;;  %v899_v4 = vld [vmem:[%s1144_s0 + $0xa0] ss:$8 sps:$4 sm:$0xff]   ;;  %v837_v7 = vcombine.low %v832_v60, %v832_v60 }
  0x1f   :  { %434 = vmatpush1.bf16.msra.mxu0 %v418_v56  ;;  %v893_v62 = vld [vmem:[%s1144_s0 + $0xb0] ss:$8 sps:$4 sm:$0xff]   ;;  %525 = vmatpush1.bf16.msra.mxu1 %v509_v57  ;;  %v904_v2 = vld [vmem:[%s1144_s0 + $0xcc] ss:$8 sps:$4 sm:$0xff]   ;;  %v850_v3 = vcombine.high %v844_v61, %v844_v61  ;;  %v381_v5 = vld [vmem:[%s1145_s1 + $0x20] sm:$0xff]  ;;  %v849_v11 = vcombine.low %v844_v61, %v844_v61 }
  0x20   :  { %435 = vmatprep.subr.bf16.mxu0 %v895_v58  ;;  %v896_v63 = vld [vmem:[%s1144_s0 + $0xd8] ss:$8 sps:$4 sm:$0xff]   ;;  %526 = vmatprep.subr.bf16.mxu1 %v898_v59  ;;  %v902_v8 = vld [vmem:[%s1144_s0 + $0xc8] ss:$8 sps:$4 sm:$0xff]   ;;  %v603_v10 = vand.u32 %v838_v1, %v969_v6  ;;  %v382_v14 = vpack.c.bf16 %v381_v5, %v381_v5  ;;  %v600_v16 = vand.u32 %v837_v7, %v969_v6  ;;  %v911_v18 = vld [vmem:[%s1144_s0 + $0x104] ss:$8 sps:$4 sm:$0xff]  }
  0x21   :  { %455 = vmatprep.mubr.bf16.mxu0 %v944_v12  ;;  %546 = vmatprep.mubr.bf16.mxu1 %v944_v12  ;;  %v472_v9 = vld [vmem:[%s1145_s1 + $0x28] sm:$0xff]  ;;  %v694_v13 = vand.u32 %v850_v3, %v969_v6  ;;  %v691_v17 = vand.u32 %v849_v11, %v969_v6  ;;  %v917_v21 = vld [vmem:[%s1144_s0 + $0xf4] ss:$8 sps:$4 sm:$0xff]   ;;  %v915_v23 = vld [vmem:[%s1144_s0 + $0xf0] ss:$8 sps:$4 sm:$0xff]  }
  0x22   :  { %v473_v15 = vpack.c.bf16 %v472_v9, %v472_v9  ;;  %v914_v19 = vld [vmem:[%s1144_s0 + $0x12c] ss:$8 sps:$4 sm:$0xff]   ;;  %v909_v20 = vld [vmem:[%s1144_s0 + $0x100] ss:$8 sps:$4 sm:$0xff]   ;;  %v920_v22 = vld [vmem:[%s1144_s0 + $0x11c] ss:$8 sps:$4 sm:$0xff]  }
  0x23   :  { %436 = vmatpush1.bf16.msra.mxu0 %v893_v62  ;;  %527 = vmatpush1.bf16.msra.mxu1 %v896_v63  ;;  %v912_v6 = vld [vmem:[%s1144_s0 + $0x128] ss:$8 sps:$4 sm:$0xff]   ;;  %v918_v25 = vld [vmem:[%s1144_s0 + $0x118] ss:$8 sps:$4 sm:$0xff]   ;;  %s945_s0 = smov [#allocation2]  }
  0x24   :  { %437 = vmatprep.subr.bf16.mxu0 %v901_v0  ;;  %528 = vmatprep.subr.bf16.mxu1 %v904_v2  ;;  %v563_v24 = vld [vmem:[%s1145_s1 + $0x30] sm:$0xff]  ;;  %v654_v26 = vld [vmem:[%s1145_s1 + $0x38] sm:$0xff]  ;;  %s750_s1 = sshll.u32 %s945_s0, 4  ;;  %s751_s1 = int_to_ptr.vmem [resolvable:$true] %s750_s1 }
  0x25   :  { %v655_v27 = vpack.c.bf16 %v654_v26, %v654_v26  ;;  %s921_s21 = scalar_lea.vmem %s751_s1, 2048  ;;  %p926_p1 = scmp.lt.s32.totalorder %s751_s1, %s751_s1 }
  0x26   :  { %p922_p0 = scmp.ne.s32.totalorder %s751_s1, %s921_s21  ;;  %p927_p2 = scmp.lt.s32.totalorder %s921_s21, %s921_s21 }
  0x27   :  { %438 = vmatpush1.bf16.msra.mxu0 %v899_v4  ;;  %529 = vmatpush1.bf16.msra.mxu1 %v902_v8 }
  0x28   :  { %615 = vmatprep.subr.bf16.mxu0 %v603_v10  ;;  %706 = vmatprep.subr.bf16.mxu1 %v694_v13  ;;  %p928_p3 = por %p927_p2, %p926_p1 }
  0x2a   :  { %815 = vmatmul.mubr.msk.bf16.vlgmr.msra.gmra.mxu0 %vm45_vm2, %v382_v14  ;;  %827 = vmatmul.mubr.msk.bf16.vlgmr.msra.gmra.mxu1 %vm45_vm2, %v473_v15  ;;  %p929_p4 = pnand %p928_p3, %p922_p0 }
  0x2b   :  { %616 = vmatpush1.bf16.msra.mxu0 %v600_v16  ;;  %707 = vmatpush1.bf16.msra.mxu1 %v691_v17 }
  0x2c   :  { %617 = vmatprep.subr.bf16.mxu0 %v911_v18  ;;  %708 = vmatprep.subr.bf16.mxu1 %v914_v19 }
  0x2d   :  { %637 = vmatprep.mubr.bf16.mxu0 %v944_v12  ;;  %728 = vmatprep.mubr.bf16.mxu1 %v944_v12  ;;  %v564_v12 = vpack.c.bf16 %v563_v24, %v563_v24 }
  0x2f   :  { %618 = vmatpush1.bf16.msra.mxu0 %v909_v20  ;;  %709 = vmatpush1.bf16.msra.mxu1 %v912_v6 }
  0x30   :  { %619 = vmatprep.subr.bf16.mxu0 %v917_v21  ;;  %710 = vmatprep.subr.bf16.mxu1 %v920_v22 }
  0x33   :  { %620 = vmatpush1.bf16.msra.mxu0 %v915_v23  ;;  %711 = vmatpush1.bf16.msra.mxu1 %v918_v25 }
  0x36   :  { %839 = vmatmul.mubr.msk.bf16.vlgmr.msra.gmra.mxu0 %vm45_vm2, %v564_v12  ;;  %851 = vmatmul.mubr.msk.bf16.vlgmr.msra.gmra.mxu1 %vm45_vm2, %v655_v27 }
  0xd2   :  { %v93_v28 = vpop.f32.mrf.mxu0  ;;  %v184_v30 = vpop.f32.mrf.mxu1 }
  0xd3   :  { %vm100_vm3 = vcmp.ge.f32.partialorder %v93_v28, 0.0  ;;  %v102_v29 = vmul.f32 0.2, %v93_v28  ;;  %vm191_vm4 = vcmp.ge.f32.partialorder %v184_v30, 0.0  ;;  %v193_v31 = vmul.f32 0.2, %v184_v30 }
  0xd4   :  { %v95_v32 = vpop.f32.mrf.mxu0  ;;  %v186_v35 = vpop.f32.mrf.mxu1 }
  0xd5   :  { %v104_v33 = vsel %vm100_vm3, %v93_v28, %v102_v29  ;;  %vm101_vm5 = vcmp.ge.f32.partialorder %v95_v32, 0.0  ;;  %v103_v34 = vmul.f32 0.2, %v95_v32  ;;  %v195_v36 = vsel %vm191_vm4, %v184_v30, %v193_v31 }
  0xd6   :  { %106 = vst [vmem:[#allocation2] sm:$0xff] %v104_v33  ;;  %vm192_vm6 = vcmp.ge.f32.partialorder %v186_v35, 0.0  ;;  %v194_v37 = vmul.f32 0.2, %v186_v35  ;;  %v97_v38 = vpop.f32.mrf.mxu0  ;;  %197 = vst [vmem:[#allocation2 + $0x10] sm:$0xff] %v195_v36  ;;  %v188_v40 = vpop.f32.mrf.mxu1 }
  0xd7   :  { %v105_v39 = vsel %vm101_vm5, %v95_v32, %v103_v34 }
  0xd8   :  { %107 = vst [vmem:[#allocation2 + $0x8] sm:$0xff] %v105_v39  ;;  %v196_v41 = vsel %vm192_vm6, %v186_v35, %v194_v37  ;;  %v98_v42 = vpop.f32.mrf.mxu0  ;;  %v189_v43 = vpop.f32.mrf.mxu1 }
  0xd9   :  { %198 = vst [vmem:[#allocation2 + $0x18] sm:$0xff] %v196_v41 }
  0xde   :  { %v275_v44 = vpop.f32.mrf.mxu0  ;;  %v366_v46 = vpop.f32.mrf.mxu1 }
  0xdf   :  { %vm282_vm7 = vcmp.ge.f32.partialorder %v275_v44, 0.0  ;;  %v284_v45 = vmul.f32 0.2, %v275_v44  ;;  %vm373_vm8 = vcmp.ge.f32.partialorder %v366_v46, 0.0  ;;  %v375_v47 = vmul.f32 0.2, %v366_v46 }
  0xe0   :  { %v277_v48 = vpop.f32.mrf.mxu0  ;;  %v368_v51 = vpop.f32.mrf.mxu1 }
  0xe1   :  { %v286_v49 = vsel %vm282_vm7, %v275_v44, %v284_v45  ;;  %vm283_vm9 = vcmp.ge.f32.partialorder %v277_v48, 0.0  ;;  %v285_v50 = vmul.f32 0.2, %v277_v48  ;;  %v377_v52 = vsel %vm373_vm8, %v366_v46, %v375_v47 }
  0xe2   :  { %288 = vst [vmem:[#allocation2 + $0x20] sm:$0xff] %v286_v49  ;;  %vm374_vm10 = vcmp.ge.f32.partialorder %v368_v51, 0.0  ;;  %v376_v53 = vmul.f32 0.2, %v368_v51  ;;  %v279_v54 = vpop.f32.mrf.mxu0  ;;  %379 = vst [vmem:[#allocation2 + $0x30] sm:$0xff] %v377_v52  ;;  %v370_v56 = vpop.f32.mrf.mxu1 }
  0xe3   :  { %v287_v55 = vsel %vm283_vm9, %v277_v48, %v285_v50 }
  0xe4   :  { %289 = vst [vmem:[#allocation2 + $0x28] sm:$0xff] %v287_v55  ;;  %v378_v57 = vsel %vm374_vm10, %v368_v51, %v376_v53  ;;  %v280_v58 = vpop.f32.mrf.mxu0  ;;  %v371_v59 = vpop.f32.mrf.mxu1 }
  0xe5   :  { %380 = vst [vmem:[#allocation2 + $0x38] sm:$0xff] %v378_v57 }
  0xea   :  { %v457_v60 = vpop.f32.mrf.mxu0  ;;  %v548_v62 = vpop.f32.mrf.mxu1 }
  0xeb   :  { %vm464_vm11 = vcmp.ge.f32.partialorder %v457_v60, 0.0  ;;  %v466_v61 = vmul.f32 0.2, %v457_v60  ;;  %vm555_vm12 = vcmp.ge.f32.partialorder %v548_v62, 0.0  ;;  %v557_v63 = vmul.f32 0.2, %v548_v62 }
  0xec   :  { %v459_v0 = vpop.f32.mrf.mxu0  ;;  %v550_v3 = vpop.f32.mrf.mxu1 }
  0xed   :  { %v468_v1 = vsel %vm464_vm11, %v457_v60, %v466_v61  ;;  %vm465_vm13 = vcmp.ge.f32.partialorder %v459_v0, 0.0  ;;  %v467_v2 = vmul.f32 0.2, %v459_v0  ;;  %v559_v4 = vsel %vm555_vm12, %v548_v62, %v557_v63 }
  0xee   :  { %470 = vst [vmem:[#allocation2 + $0x40] sm:$0xff] %v468_v1  ;;  %vm556_vm14 = vcmp.ge.f32.partialorder %v550_v3, 0.0  ;;  %v558_v5 = vmul.f32 0.2, %v550_v3  ;;  %v461_v7 = vpop.f32.mrf.mxu0  ;;  %561 = vst [vmem:[#allocation2 + $0x50] sm:$0xff] %v559_v4  ;;  %v552_v9 = vpop.f32.mrf.mxu1 }
  0xef   :  { %v469_v8 = vsel %vm465_vm13, %v459_v0, %v467_v2 }
  0xf0   :  { %471 = vst [vmem:[#allocation2 + $0x48] sm:$0xff] %v469_v8  ;;  %v560_v10 = vsel %vm556_vm14, %v550_v3, %v558_v5  ;;  %v462_v11 = vpop.f32.mrf.mxu0  ;;  %v553_v13 = vpop.f32.mrf.mxu1 }
  0xf1   :  { %562 = vst [vmem:[#allocation2 + $0x58] sm:$0xff] %v560_v10 }
  0xf6   :  { %v639_v14 = vpop.f32.mrf.mxu0  ;;  %v730_v16 = vpop.f32.mrf.mxu1 }
  0xf7   :  { %vm646_vm15 = vcmp.ge.f32.partialorder %v639_v14, 0.0  ;;  %v648_v15 = vmul.f32 0.2, %v639_v14  ;;  %vm737_vm0 = vcmp.ge.f32.partialorder %v730_v16, 0.0  ;;  %v739_v17 = vmul.f32 0.2, %v730_v16 }
  0xf8   :  { %v641_v18 = vpop.f32.mrf.mxu0  ;;  %v732_v6 = vpop.f32.mrf.mxu1 }
  0xf9   :  { %v650_v19 = vsel %vm646_vm15, %v639_v14, %v648_v15  ;;  %vm647_vm1 = vcmp.ge.f32.partialorder %v641_v18, 0.0  ;;  %v649_v20 = vmul.f32 0.2, %v641_v18  ;;  %v741_v21 = vsel %vm737_vm0, %v730_v16, %v739_v17 }
  0xfa   :  { %652 = vst [vmem:[#allocation2 + $0x60] sm:$0xff] %v650_v19  ;;  %vm738_vm2 = vcmp.ge.f32.partialorder %v732_v6, 0.0  ;;  %v740_v22 = vmul.f32 0.2, %v732_v6  ;;  %v643_v23 = vpop.f32.mrf.mxu0  ;;  %743 = vst [vmem:[#allocation2 + $0x70] sm:$0xff] %v741_v21  ;;  %v734_v25 = vpop.f32.mrf.mxu1 }
  0xfb   :  { %v651_v24 = vsel %vm647_vm1, %v641_v18, %v649_v20 }
  0xfc   :  { %653 = vst [vmem:[#allocation2 + $0x68] sm:$0xff] %v651_v24  ;;  %v742_v26 = vsel %vm738_vm2, %v732_v6, %v740_v22  ;;  %v644_v12 = vpop.f32.mrf.mxu0  ;;  %v735_v27 = vpop.f32.mrf.mxu1 }
  0xfd   :  { %744 = vst [vmem:[#allocation2 + $0x78] sm:$0xff] %v742_v26 }
  0xfe   :  { %932 = shalt.err (!%p929_p4)
}
  0xff   :  { %s946_s22 = smov 256   ;;  %s947_s23 = smov 16  }
 0x100   :  { %756 = dma.vmem_to_hbm [thread:$0]  %s751_s1, 2048, %s1146_s2, [#allocation3], %s946_s22, %s946_s22, %s947_s23  }
 0x101   :  { %941 = dma.done.wait [#allocation3], 2048  }
 0x102   :  { %942 = vsyncadd [#allocation3], 4294965248 }
 0x103   :  { %760 = vsyncpa [#allocation3], 1 }

</bundles_post_ra>
